<compile_context>
chip_gen: v7x
topology: tpu7x:2x2x1
jax: 0.10.0
libtpu: 0.0.40
codegen_flags: <defaults>
</compile_context>

<pallas_src>
import math

import jax
import jax.numpy as jnp
from jax.experimental import pallas as pl
from jax.experimental.pallas import tpu as pltpu


def _round_up(x, m):
    return (x + m - 1) // m * m


def sae_kernel(x_ref, we_ref, be_ref, wd_ref, bd_ref, dec_ref, enc_ref):
    """One (batch-tile i, hidden-tile h) step of the SAE forward.

    x_ref  : (tb, Dp)      input tile (compute dtype); resident across h
    we_ref : (nH, Dp, th)  FULL encoder weight, VMEM-resident ([in, out] tiles)
    be_ref : (nH, 1,  th)  FULL encoder bias, VMEM-resident (f32)
    wd_ref : (nH, th, Dp)  FULL decoder weight, VMEM-resident ([in, out] tiles)
    bd_ref : (1, Dp)       decoder bias (f32, grid-invariant)
    dec_ref: (tb, Dp)      decoded output block (f32, resident across h,
                           used directly as the accumulator)
    enc_ref: (tb, th)      encoded output tile
    """
    h = pl.program_id(1)

    we_tile = we_ref[h]                               # (Dp, th)
    be_tile = be_ref[h]                               # (1,  th)
    wd_tile = wd_ref[h]                               # (th, Dp)

    # Encoder: Linear + ReLU for this hidden tile (MXU, f32 accumulate).
    pre = jnp.dot(x_ref[...], we_tile, preferred_element_type=jnp.float32)
    enc = jnp.maximum(pre + be_tile, 0.0)             # f32 epilogue on the VPU
    enc_ref[...] = enc.astype(enc_ref.dtype)

    # Decoder: accumulate this hidden tile's contribution directly into the
    # resident decoded output block (no scratch, no finalize copy).
    contrib = jnp.dot(enc.astype(wd_tile.dtype), wd_tile,
                      preferred_element_type=jnp.float32)

    @pl.when(h == 0)
    def _init():
        dec_ref[...] = jnp.broadcast_to(bd_ref[...], dec_ref.shape)

    dec_ref[...] += contrib


def prepare_sae_params(w_enc, b_enc, w_dec, b_dec, *, th=1024,
                       compute_dtype=jnp.bfloat16):
    """One-time parameter prep (transpose / pad / tile-pack / cast), hoisted
    out of the per-call forward path.

    w_enc: [H, D], b_enc: [H], w_dec: [D, H], b_dec: [D]  (torch [out, in]).

    Weights are packed as (num_hidden_tiles, ., .) so the kernel selects a
    hidden tile with a leading-dim dynamic index while the full weights stay
    VMEM-resident (~2.6 MiB each at H=1e4, Dp=128, bf16).
    # TODO(synk): optional fp8 weights on v7x (accuracy-gated) would halve
    # the resident weight footprint further.
    """
    H, D = w_enc.shape
    assert w_dec.shape == (D, H), (w_dec.shape, (D, H))

    Dp = _round_up(D, 128)                    # lane-dense x loads / dec stores
    th = _round_up(min(th, _round_up(H, 128)), 128)
    Hp = _round_up(H, th)
    nH = Hp // th

    # Encoder weight: torch [H, D] -> [D, H] padded -> (nH, Dp, th) tiles.
    we2 = jnp.zeros((Dp, Hp), compute_dtype).at[:D, :H].set(
        jnp.asarray(w_enc).T.astype(compute_dtype))
    we = we2.reshape(Dp, nH, th).transpose(1, 0, 2)          # (nH, Dp, th)

    # Decoder weight: torch [D, H] -> [H, D] padded -> (nH, th, Dp) tiles.
    wd2 = jnp.zeros((Hp, Dp), compute_dtype).at[:H, :D].set(
        jnp.asarray(w_dec).T.astype(compute_dtype))
    wd = wd2.reshape(nH, th, Dp)                             # (nH, th, Dp)

    be = (jnp.zeros((Hp,), jnp.float32)
          .at[:H].set(jnp.asarray(b_enc, dtype=jnp.float32))
          .reshape(nH, 1, th))                               # (nH, 1, th)
    bd = jnp.zeros((1, Dp), jnp.float32).at[0, :D].set(
        jnp.asarray(b_dec, dtype=jnp.float32))

    return dict(we=we, be=be, wd=wd, bd=bd, D=D, H=H, Dp=Dp, Hp=Hp, th=th,
                nH=nH, compute_dtype=compute_dtype)


def sparse_autoencoder_forward(x, params, *, tb=1024, encoded_dtype=None):
    """x: [B, D] -> (decoded [B, D], encoded [B, H]).

    Same math as the PyTorch module; bf16 MXU operands, f32 accumulation.

    tb: batch tile (multiple of 8).  Large tiles (1024-2048) are appropriate
    on every TPU generation -- VMEM is not the binding constraint here (the
    footprint at tb=th=1024 is ~20 MiB vs 64 MiB on v7x / 128 MiB on
    v5e/v6e), and vmem_limit_bytes is raised explicitly below.

    encoded_dtype: dtype the kernel writes `encoded` in.  Default x.dtype
    (matches the PyTorch module and avoids any post-kernel convert copy).
    Pass jnp.bfloat16 to halve the dominant B x H HBM write -- the decoder
    already consumes a bf16 cast, so no downstream precision is lost.
    """
    B, D = x.shape
    assert D == params["D"], (D, params["D"])
    Dp, Hp, th, nH = params["Dp"], params["Hp"], params["th"], params["nH"]
    H = params["H"]
    cdt = params["compute_dtype"]
    enc_dtype = x.dtype if encoded_dtype is None else encoded_dtype

    # Batch tile: multiple of 8, never larger than the (padded) batch.
    tb = _round_up(max(8, min(tb, _round_up(B, 8))), 8)
    # Prefer >= 2 batch tiles so the "parallel" batch axis can shard across
    # the two TensorCores on v7x (v5e/v6e have a single TC; unaffected).
    if B >= 16 and _round_up(B, tb) // tb < 2:
        tb = _round_up(pl.cdiv(B, 2), 8)
    Bp = _round_up(B, tb)

    xp = jnp.zeros((Bp, Dp), cdt).at[:B, :D].set(x.astype(cdt))

    grid = (Bp // tb, nH)
    cbytes = jnp.dtype(cdt).itemsize
    ebytes = jnp.dtype(enc_dtype).itemsize
    cost = pl.CostEstimate(
        flops=4 * Bp * Dp * Hp,                   # two matmuls, 2*M*K*N each
        transcendentals=0,
        bytes_accessed=(Bp * Dp * cbytes          # x (read once; resident over h)
                        + 2 * Hp * Dp * cbytes    # weights (read once; VMEM-resident)
                        + (Hp + Dp) * 4           # biases
                        + Bp * Hp * ebytes        # encoded write
                        + Bp * Dp * 4),           # decoded write
    )

    dec, enc = pl.pallas_call(
        sae_kernel,
        out_shape=(
            jax.ShapeDtypeStruct((Bp, Dp), jnp.float32),   # decoded (padded)
            jax.ShapeDtypeStruct((Bp, Hp), enc_dtype),     # encoded (padded)
        ),
        grid_spec=pltpu.PrefetchScalarGridSpec(
            num_scalar_prefetch=0,
            grid=grid,
            in_specs=[
                pl.BlockSpec((tb, Dp), lambda i, h: (i, 0)),          # x (resident over h)
                pl.BlockSpec((nH, Dp, th), lambda i, h: (0, 0, 0)),   # encoder W (resident)
                pl.BlockSpec((nH, 1, th), lambda i, h: (0, 0, 0)),    # encoder b (resident)
                pl.BlockSpec((nH, th, Dp), lambda i, h: (0, 0, 0)),   # decoder W (resident)
                pl.BlockSpec((1, Dp), lambda i, h: (0, 0)),           # decoder b (invariant)
            ],
            out_specs=[
                pl.BlockSpec((tb, Dp), lambda i, h: (i, 0)),   # decoded (resident accumulator)
                pl.BlockSpec((tb, th), lambda i, h: (i, h)),   # encoded tile
            ],
        ),
        compiler_params=pltpu.CompilerParams(
            dimension_semantics=("parallel", "arbitrary"),
            vmem_limit_bytes=48 * 1024 * 1024,
        ),
        cost_estimate=cost,
    )(xp, params["we"], params["be"], params["wd"], params["bd"])

    # When B/H are already tile-aligned these slices are free; for the real
    # model (H=1e4, not a multiple of 128) callers that can consume the padded
    # (Bp, Hp) encoded array directly avoid one extra HBM round-trip of the
    # largest tensor.
    return dec[:B, :D].astype(x.dtype), enc[:B, :H]


if __name__ == "__main__":
    # Small deterministic shapes consistent with the module:
    # input_size stands in for reps.shape[1] (~20 in the l20 model),
    # hidden_size stands in for 10**4 (scaled down).
    batch = 16
    input_size = 32
    hidden_size = 256

    key = jax.random.PRNGKey(0)
    kx, kwe, kbe, kwd, kbd = jax.random.split(key, 5)

    x = jax.random.normal(kx, (batch, input_size), dtype=jnp.float32)

    # nn.Linear-style uniform(-1/sqrt(fan_in), 1/sqrt(fan_in)) init.
    bound_e = 1.0 / math.sqrt(input_size)
    bound_d = 1.0 / math.sqrt(hidden_size)
    w_enc = jax.random.uniform(kwe, (hidden_size, input_size), jnp.float32,
                               minval=-bound_e, maxval=bound_e)
    b_enc = jax.random.uniform(kbe, (hidden_size,), jnp.float32,
                               minval=-bound_e, maxval=bound_e)
    w_dec = jax.random.uniform(kwd, (input_size, hidden_size), jnp.float32,
                               minval=-bound_d, maxval=bound_d)
    b_dec = jax.random.uniform(kbd, (input_size,), jnp.float32,
                               minval=-bound_d, maxval=bound_d)

    # Parameters prepared once (transpose / pad / tile-pack / bf16 cast hoisted
    # out of the forward path).  Small th here so the test exercises a 2x2
    # grid (2 batch tiles x 2 hidden tiles): megacore-parallel batch axis plus
    # hidden-axis decoder accumulation into the resident output block.
    params = prepare_sae_params(w_enc, b_enc, w_dec, b_dec, th=128)

    decoded, encoded = sparse_autoencoder_forward(x, params)
    jax.block_until_ready((decoded, encoded))
    assert decoded.shape == (batch, input_size)
    assert encoded.shape == (batch, hidden_size)

    # Plain-JAX reference (same semantics as the PyTorch forward).  Tolerance
    # reflects bf16 MXU operands with f32 accumulation.
    enc_ref = jnp.maximum(x @ w_enc.T + b_enc, 0.0)
    dec_ref = enc_ref @ w_dec.T + b_dec
    assert jnp.allclose(encoded, enc_ref, atol=3e-2, rtol=3e-2), \
        float(jnp.max(jnp.abs(encoded - enc_ref)))
    assert jnp.allclose(decoded, dec_ref, atol=3e-2, rtol=3e-2), \
        float(jnp.max(jnp.abs(decoded - dec_ref)))

    # bf16-encoded variant (halves the dominant B x H HBM write stream).
    dec_b, enc_b = sparse_autoencoder_forward(x, params,
                                              encoded_dtype=jnp.bfloat16)
    jax.block_until_ready((dec_b, enc_b))
    assert enc_b.dtype == jnp.bfloat16
    assert jnp.allclose(enc_b.astype(jnp.float32), enc_ref, atol=5e-2, rtol=5e-2)
    assert jnp.allclose(dec_b, dec_ref, atol=3e-2, rtol=3e-2)

    print("KERNEL_OK")
</pallas_src>

<mosaic_0001>
module attributes {stable_mosaic.version = 11 : i64} {
  func.func @sae_kernel(%arg0: i32, %arg1: i32, %arg2: memref<8x128xbf16, #tpu.memory_space<vmem>>, %arg3: memref<2x128x128xbf16, #tpu.memory_space<vmem>>, %arg4: memref<2x1x128xf32, #tpu.memory_space<vmem>>, %arg5: memref<2x128x128xbf16, #tpu.memory_space<vmem>>, %arg6: memref<1x128xf32, #tpu.memory_space<vmem>>, %arg7: memref<8x128xf32, #tpu.memory_space<vmem>>, %arg8: memref<8x128xf32, #tpu.memory_space<vmem>>) attributes {dimension_semantics = [#tpu.dimension_semantics<parallel>, #tpu.dimension_semantics<arbitrary>], iteration_bounds = array<i64: 2, 2>, scalar_prefetch = 0 : i64, scratch_operands = 0 : i64, tpu.core_type = #tpu.core_type<tc>, window_params = [{transform_indices = @transform_0, window_bounds = array<i64: 8, 128>}, {pipeline_mode = #tpu.pipeline_mode<synchronous>, transform_indices = @transform_1, window_bounds = array<i64: 2, 128, 128>}, {pipeline_mode = #tpu.pipeline_mode<synchronous>, transform_indices = @transform_2, window_bounds = array<i64: 2, 1, 128>}, {pipeline_mode = #tpu.pipeline_mode<synchronous>, transform_indices = @transform_3, window_bounds = array<i64: 2, 128, 128>}, {pipeline_mode = #tpu.pipeline_mode<synchronous>, transform_indices = @transform_4, window_bounds = array<i64: 1, 128>}, {transform_indices = @transform_5, window_bounds = array<i64: 8, 128>}, {transform_indices = @transform_6, window_bounds = array<i64: 8, 128>}]} {
    %0 = arith.index_cast %arg1 : i32 to index
    %c0 = arith.constant 0 : index
    %c0_0 = arith.constant 0 : index
    %1 = vector.load %arg3[%0, %c0, %c0_0] : memref<2x128x128xbf16, #tpu.memory_space<vmem>>, vector<1x128x128xbf16>
    %2 = vector.shape_cast %1 : vector<1x128x128xbf16> to vector<128x128xbf16>
    %3 = arith.index_cast %arg1 : i32 to index
    %c0_1 = arith.constant 0 : index
    %c0_2 = arith.constant 0 : index
    %4 = vector.load %arg4[%3, %c0_1, %c0_2] : memref<2x1x128xf32, #tpu.memory_space<vmem>>, vector<1x1x128xf32>
    %5 = vector.shape_cast %4 : vector<1x1x128xf32> to vector<1x128xf32>
    %6 = arith.index_cast %arg1 : i32 to index
    %c0_3 = arith.constant 0 : index
    %c0_4 = arith.constant 0 : index
    %7 = vector.load %arg5[%6, %c0_3, %c0_4] : memref<2x128x128xbf16, #tpu.memory_space<vmem>>, vector<1x128x128xbf16>
    %8 = vector.shape_cast %7 : vector<1x128x128xbf16> to vector<128x128xbf16>
    %c0_5 = arith.constant 0 : index
    %c0_6 = arith.constant 0 : index
    %9 = vector.load %arg2[%c0_5, %c0_6] : memref<8x128xbf16, #tpu.memory_space<vmem>>, vector<8x128xbf16>
    %cst = arith.constant dense<0.000000e+00> : vector<8x128xf32>
    %10 = tpu.matmul %9, %2, %cst {dimension_numbers = #tpu.dot_dimension_numbers<[1], [0], [0], [1], [0, 0, 1, 1], [], []>} : vector<8x128xbf16>, vector<128x128xbf16>, vector<8x128xf32> -> vector<8x128xf32>
    %11 = vector.broadcast %5 : vector<1x128xf32> to vector<8x128xf32>
    %12 = arith.addf %10, %11 : vector<8x128xf32>
    %cst_7 = arith.constant 0.000000e+00 : f32
    %13 = vector.broadcast %cst_7 : f32 to vector<8x128xf32>
    %14 = arith.maximumf %12, %13 : vector<8x128xf32>
    %c0_8 = arith.constant 0 : index
    %c0_9 = arith.constant 0 : index
    %15 = vector.load %arg8[%c0_8, %c0_9] : memref<8x128xf32, #tpu.memory_space<vmem>>, vector<8x128xf32>
    tpu.vector_store %arg8[%c0_8, %c0_9], %14 {strides = array<i32>} : memref<8x128xf32, #tpu.memory_space<vmem>>, vector<8x128xf32>,
    %16 = arith.truncf %14 : vector<8x128xf32> to vector<8x128xbf16>
    %cst_10 = arith.constant dense<0.000000e+00> : vector<8x128xf32>
    %17 = tpu.matmul %16, %8, %cst_10 {dimension_numbers = #tpu.dot_dimension_numbers<[1], [0], [0], [1], [0, 0, 1, 1], [], []>} : vector<8x128xbf16>, vector<128x128xbf16>, vector<8x128xf32> -> vector<8x128xf32>
    %c0_i32 = arith.constant 0 : i32
    %18 = arith.cmpi eq, %arg1, %c0_i32 : i32
    %19 = arith.extui %18 : i1 to i32
    %c0_i32_11 = arith.constant 0 : i32
    %20 = arith.cmpi ne, %19, %c0_i32_11 : i32
    scf.if %20 {
      %c0_16 = arith.constant 0 : index
      %c0_17 = arith.constant 0 : index
      %24 = vector.load %arg6[%c0_16, %c0_17] : memref<1x128xf32, #tpu.memory_space<vmem>>, vector<1x128xf32>
      %25 = vector.shape_cast %24 : vector<1x128xf32> to vector<1x128xf32>
      %26 = vector.broadcast %25 : vector<1x128xf32> to vector<8x128xf32>
      %c0_18 = arith.constant 0 : index
      %c0_19 = arith.constant 0 : index
      %27 = vector.load %arg7[%c0_18, %c0_19] : memref<8x128xf32, #tpu.memory_space<vmem>>, vector<8x128xf32>
      tpu.vector_store %arg7[%c0_18, %c0_19], %26 {strides = array<i32>} : memref<8x128xf32, #tpu.memory_space<vmem>>, vector<8x128xf32>,
    } else {
    }
    %c0_12 = arith.constant 0 : index
    %c0_13 = arith.constant 0 : index
    %21 = vector.load %arg7[%c0_12, %c0_13] : memref<8x128xf32, #tpu.memory_space<vmem>>, vector<8x128xf32>
    %22 = arith.addf %21, %17 : vector<8x128xf32>
    %c0_14 = arith.constant 0 : index
    %c0_15 = arith.constant 0 : index
    %23 = vector.load %arg7[%c0_14, %c0_15] : memref<8x128xf32, #tpu.memory_space<vmem>>, vector<8x128xf32>
    tpu.vector_store %arg7[%c0_14, %c0_15], %22 {strides = array<i32>} : memref<8x128xf32, #tpu.memory_space<vmem>>, vector<8x128xf32>,
    return
  }
  func.func @transform_0(%arg0: i32, %arg1: i32) -> (i32, i32) {
    %c0_i32 = arith.constant 0 : i32
    %c0_i32_0 = arith.constant 0 : i32
    return %arg0, %c0_i32 : i32, i32
  }
  func.func @transform_1(%arg0: i32, %arg1: i32) -> (i32, i32, i32) {
    %c0_i32 = arith.constant 0 : i32
    %c0_i32_0 = arith.constant 0 : i32
    %c0_i32_1 = arith.constant 0 : i32
    %c0_i32_2 = arith.constant 0 : i32
    return %c0_i32, %c0_i32_0, %c0_i32_1 : i32, i32, i32
  }
  func.func @transform_2(%arg0: i32, %arg1: i32) -> (i32, i32, i32) {
    %c0_i32 = arith.constant 0 : i32
    %c0_i32_0 = arith.constant 0 : i32
    %c0_i32_1 = arith.constant 0 : i32
    %c0_i32_2 = arith.constant 0 : i32
    return %c0_i32, %c0_i32_0, %c0_i32_1 : i32, i32, i32
  }
  func.func @transform_3(%arg0: i32, %arg1: i32) -> (i32, i32, i32) {
    %c0_i32 = arith.constant 0 : i32
    %c0_i32_0 = arith.constant 0 : i32
    %c0_i32_1 = arith.constant 0 : i32
    %c0_i32_2 = arith.constant 0 : i32
    return %c0_i32, %c0_i32_0, %c0_i32_1 : i32, i32, i32
  }
  func.func @transform_4(%arg0: i32, %arg1: i32) -> (i32, i32) {
    %c0_i32 = arith.constant 0 : i32
    %c0_i32_0 = arith.constant 0 : i32
    %c0_i32_1 = arith.constant 0 : i32
    return %c0_i32, %c0_i32_0 : i32, i32
  }
  func.func @transform_5(%arg0: i32, %arg1: i32) -> (i32, i32) {
    %c0_i32 = arith.constant 0 : i32
    %c0_i32_0 = arith.constant 0 : i32
    return %arg0, %c0_i32 : i32, i32
  }
  func.func @transform_6(%arg0: i32, %arg1: i32) -> (i32, i32) {
    %c0_i32 = arith.constant 0 : i32
    return %arg0, %arg1 : i32, i32
  }
}

</mosaic_0001>

<bundles_post_ra>
// kernel: tpu_custom_call.1
= control target key start
LH: loop header
LB: loop body
LE: loop exit
PB: predicated region body
PF: predicated region fallthrough
CT: control target
= control target key end

     0   :  { %s1661_s0 = inlined_call_operand.hbm [shape: bf16[16,128], index: 0, kind: input, shape index: {}]   ;;  %s1662_s1 = inlined_call_operand.hbm [shape: bf16[2,128,128], index: 1, kind: input, shape index: {}]   ;;  %s1663_s2 = inlined_call_operand.vmem [shape: f32[2,1,128], index: 2, kind: input, shape index: {}]   ;;  %s1664_s3 = inlined_call_operand.hbm [shape: bf16[2,128,128], index: 3, kind: input, shape index: {}]   ;;  %s1665_s4 = inlined_call_operand.vmem [shape: f32[1,128], index: 4, kind: input, shape index: {}]   ;;  %s1666_s5 = inlined_call_operand.hbm [shape: f32[16,128], index: 5, kind: output, shape index: {0}]   ;;  %s1667_s6 = inlined_call_operand.hbm [shape: f32[16,256], index: 6, kind: output, shape index: {1}]  }
   0x1   :  { %1685 = sst [smem:[#allocation23_spill]] %s1662_s1 }
   0x2   :  { %1686 = sst [smem:[#allocation24_spill]] %s1664_s3 }
   0x3   :  { %1687 = sst [smem:[#allocation25_spill]] %s1666_s5 }
   0x4   :  { %1688 = sst [smem:[#allocation26_spill]] %s1667_s6 }
   0x5   :  { %12 = vsyncpa [#allocation3], 0 }
   0x6   :  { %14 = vsyncpa [#allocation3 + $0x1], 0 }
   0x7   :  { %15 = vsyncpa [#allocation6], 0 }
   0x8   :  { %16 = vsyncpa [#allocation4], 0 }
   0x9   :  { %18 = vsyncpa [#allocation4 + $0x1], 0 }
   0xa   :  { %19 = vsyncpa [#allocation10], 0 }
   0xb   :  { %21 = vsyncpa [#allocation10 + $0x1], 0  ;;  %s1276_s21 = smov 0   ;;  %s1278_s22 = smov 0  }
   0xc   :  { %s1280_s23 = smov 0   ;;  %s1282_s24 = smov 0  }
   0xd   :  { %s1284_s25 = smov 0   ;;  %s1286_s26 = smov 0  }
   0xe   :  { %s1288_s27 = smov 0   ;;  %s1290_s28 = smov 0  }
   0xf   :  { %s1292_s29 = smov 0   ;;  %s1294_s30 = smov 0  }
  0x10   :  { %s1296_s7 = smov 0  }
  0x11 LB: > { %1689 = sst [smem:[#allocation15_spill]] %s1190_s21  ;;  %s735_s8 = sadd.s32 4294967295, %s1230_s7   ;;  %s1230_s7 = sphi %s1296_s7, %s27_s7   ;;  %s1226_s30 = sphi %s1294_s30, %s1734_s30   ;;  %s1222_s29 = sphi %s1292_s29, %s1726_s29   ;;  %s1218_s28 = sphi %s1290_s28, %s1733_s28   ;;  %s1214_s27 = sphi %s1288_s27, %s1725_s27   ;;  %s1210_s26 = sphi %s1286_s26, %s1732_s26   ;;  %s1206_s25 = sphi %s1284_s25, %s1731_s25   ;;  %s1202_s24 = sphi %s1282_s24, %s1730_s24   ;;  %s1198_s23 = sphi %s1280_s23, %s1729_s23   ;;  %s1194_s22 = sphi %s1278_s22, %s1728_s22   ;;  %s1190_s21 = sphi %s1276_s21, %s1727_s21  }
  0x12   : > { %1690 = sst [smem:[#allocation16_spill]] %s1202_s24  ;;  %s736_s9 = sadd.s32 4294967294, %s1230_s7  }
  0x13   : > { %1691 = sst [smem:[#allocation17_spill]] %s1218_s28  ;;  %p59_p0 = scmp.ne.s32.totalorder %s1206_s25, %s1202_s24 }
  0x14   : > { %1692 = sst [smem:[#allocation18_spill]] %s1222_s29  ;;  %p1335_p1 = scmp.eq.s32.totalorder %s735_s8, 0 }
  0x15   : > { %p1339_p2 = scmp.eq.s32.totalorder %s735_s8, 3  ;;  %p173_p3 = scmp.eq.s32.totalorder %s736_s9, 3 }
  0x16   : > { %s1693_s10 = scalar_select %p1335_p1, 1, 0 }
  0x17   : > { %s1694_s11 = scalar_select %p1339_p2, 1, 0 }
  0x18   : > { %p1345_p4 = por %p1335_p1, %p59_p0  ;;  %p194_p5 = scmp.ne.s32.totalorder %s1198_s23, %s1194_s22 }
  0x19   : > { %p1351_p6 = por %p173_p3, %p59_p0  ;;  %p200_p7 = scmp.ne.s32.totalorder %s1194_s22, %s1190_s21 }
  0x1a   : > { %s1695_s12 = scalar_select %p1345_p4, 1, 0 }
  0x1b   : > { %s1696_s13 = scalar_select %p1351_p6, 1, 0 }
  0x1c   : > { %p1359_p8 = por %p194_p5, %p1339_p2  ;;  %p737_p9 = scmp.ge.s32.totalorder %s1230_s7, 1 }
  0x1d   : > { %1697 = sst [smem:[#allocation19_spill]] %s1696_s13  ;;  %p1364_p10 = por %p200_p7, %p173_p3 }
  0x1e   : > { %s1698_s14 = scalar_select %p1359_p8, 1, 0 }
  0x1f   : > { %s1700_s15 = scalar_select %p1364_p10, 1, 0 }
  0x20   : > { %1699 = sst [smem:[#allocation20_spill]] %s1698_s14  ;;  %p208_p11 = scmp.lt.s32.totalorder %s1230_s7, 5 }
  0x21   : > { %1701 = sst [smem:[#allocation21_spill]] %s1700_s15  ;;  %s1232_s17 = smov [#allocation5]  }
  0x22   : > { %p1369_p12 = pnand %p737_p9, %p208_p11  ;;  %s220_s18 = sshll.u32 %s1232_s17, 4  ;;  %s221_s18 = int_to_ptr.vmem [resolvable:$true] %s220_s18 }
  0x23   : > { %s1233_s20 = smov [#allocation7]   ;;  %s1704_s1 = sld [smem:[#allocation23_spill]] }
  0x24   : > { %s1702_s16 = scalar_select %p1369_p12, 1, 0 }
  0x25   : > { %p852_p13 = pneg %p1369_p12  ;;  %s236_s8 = sshll.u32 %s1233_s20, 4  ;;  %s1381_s8 = int_to_ptr.vmem [resolvable:$true] %s236_s8 }
  0x27   : > { %p1377_p0 = pnand %p852_p13, %p1335_p1 }
  0x29   : > { %s986_s21 = scalar_lea.hbm %s1704_s1, 2048  ;;  %p988_p5 = pneg %p1377_p0 }
  0x2a   : > { %p987_p3 = scmp.ne.s32.totalorder %s1704_s1, %s986_s21  ;;  %p993_p11 = scmp.lt.u32.totalorder %s986_s21, %s1704_s1 }
  0x2c   : > { %p989_p7 = pnand %p988_p5, %p987_p3 }
  0x2e   : > { %p990_p9 = pneg %p989_p7 }
  0x30   : > { %p995_p13 = pnand %p993_p11, %p990_p9 }
  0x32   : > { %998 = shalt.err (!%p995_p13)
}
  0x33   : > { %s999_s20 = scalar_lea.vmem %s221_s18, 2048  ;;  %p1007_p1 = scmp.lt.s32.totalorder %s221_s18, %s221_s18 }
  0x34   : > { %p1000_p10 = scmp.ne.s32.totalorder %s221_s18, %s999_s20  ;;  %p1008_p4 = scmp.lt.s32.totalorder %s999_s20, %s999_s20 }
  0x36   : > { %p1002_p6 = pnand %p1000_p10, %p988_p5  ;;  %p1009_p12 = por %p1008_p4, %p1007_p1 }
  0x38   : > { %p1003_p8 = pneg %p1002_p6 }
  0x3a   : > { %p1010_p2 = pnand %p1009_p12, %p1003_p8 }
  0x3c   : > { %1013 = shalt.err (!%p1010_p2)
}
  0x3d   : > { %s1234_s13 = smov 64   ;;  %s1235_s15 = smov 4  }
  0x3e   : > { %855 = dma.hbm_to_vmem [thread:$0]  (!%p1377_p0), %s1704_s1, 2048, %s221_s18, [#allocation6], %s1234_s13, %s1234_s13, %s1235_s15  }
  0x3f   : > { %s1705_s3 = sld [smem:[#allocation24_spill]] }
  0x45   : > { %s1014_s17 = scalar_lea.hbm %s1705_s3, 2048 }
  0x46   : > { %p1015_p6 = scmp.ne.s32.totalorder %s1705_s3, %s1014_s17  ;;  %p1021_p4 = scmp.lt.u32.totalorder %s1014_s17, %s1705_s3 }
  0x48   : > { %p1017_p1 = pnand %p1015_p6, %p988_p5 }
  0x4a   : > { %p1018_p2 = pneg %p1017_p1 }
  0x4c   : > { %p1023_p8 = pnand %p1021_p4, %p1018_p2 }
  0x4e   : > { %1026 = shalt.err (!%p1023_p8)
}
  0x4f   : > { %s1027_s18 = scalar_lea.vmem %s1381_s8, 2048  ;;  %p1035_p7 = scmp.lt.s32.totalorder %s1381_s8, %s1381_s8 }
  0x50   : > { %p1028_p10 = scmp.ne.s32.totalorder %s1381_s8, %s1027_s18  ;;  %p1036_p9 = scmp.lt.s32.totalorder %s1027_s18, %s1027_s18 }
  0x52   : > { %p1030_p12 = pnand %p1028_p10, %p988_p5  ;;  %p1037_p11 = por %p1036_p9, %p1035_p7 }
  0x54   : > { %p1031_p3 = pneg %p1030_p12 }
  0x56   : > { %p1038_p13 = pnand %p1037_p11, %p1031_p3 }
  0x58   : > { %1041 = shalt.err (!%p1038_p13)
}
  0x59   : > { %858 = dma.hbm_to_vmem [thread:$0]  (!%p1377_p0), %s1705_s3, 2048, %s1381_s8, [#allocation6], %s1234_s13, %s1234_s13, %s1235_s15  }
  0x5a   : > { %s36_s14 = sadd.s32 1, %s1222_s29  ;;  %s39_s19 = sadd.s32 1, %s1226_s30 }
  0x5b   : > { %p37_p5 = scmp.ge.s32.totalorder %s36_s14, 2  ;;  %s46_s6 = sadd.s32 1, %s1210_s26 }
  0x5c   : > { %p53_p6 = scmp.ne.s32.totalorder %s1210_s26, %s1206_s25  ;;  %p54_p1 = scmp.eq.s32.totalorder %s1230_s7, 0 }
  0x5d   : > { %s1736_s14 = smov (%p37_p5, %s36_s14), 0  ;;  %s1738_s19 = smov (!%p37_p5, %s39_s19), %s1226_s30 }
  0x5e   : > { %1706 = sst [smem:[#allocation22_spill]] %s1736_s14  ;;  %p1439_p2 = por %p54_p1, %p53_p6 }
  0x5f   : > { %p1708_p0 = scmp.ne.s32.totalorder %s1694_s11, 0  ;;  %p41_p8 = scmp.ge.s32.totalorder %s1738_s19, 2 }
  0x60   : > { %s180_s13 = ssub.s32 %s1222_s29, %s1736_s14  ;;  %s184_s15 = sadd.s32 1, %s1198_s23 }
  0x61   : > { %p1445_p4 = por %p1708_p0, %p53_p6  ;;  %p872_p10 = scmp.lt.s32.totalorder %s1230_s7, 4 }
  0x62   : > { %s1740_s19 = smov (%p41_p8, %s1738_s19), 0  ;;  %s253_s24 = sand.u32 1, %s1210_s26  }
  0x63   : > { %s742_s9 = sshll.u32 %s1226_s30, 6  ;;  %s43_s17 = ssub.s32 %s1226_s30, %s1740_s19 }
  0x64   : > { %p44_p12 = scmp.eq.s32.totalorder %s43_s17, 0  ;;  %s181_s20 = sor.u32 %s180_s13, %s43_s17 }
  0x65   : > { %p182_p3 = scmp.eq.s32.totalorder %s181_s20, 0  ;;  %s741_s11 = sshll.u32 %s253_s24, 2 }
  0x66   : > { %s1460_s18 = scalar_select %p44_p12, %s1210_s26, %s46_s6  }
  0x67   : > { %s1463_s5 = scalar_select %p182_p3, %s1198_s23, %s184_s15  }
  0x68   : > { %s1468_s3 = scalar_lea.hbm %s1661_s0, %s742_s9  ;;  %s257_s14 = scalar_lea.vmem [#allocation2], %s741_s11 }
  0x69   : > { %s264_s29 = sshll.u32 %s257_s14, 4  ;;  %p1474_p7 = pnand %p872_p10, %p1439_p2  ;;  %s1478_s29 = int_to_ptr.vmem [resolvable:$true] %s264_s29 }
  0x6a   : > { %s254_s6 = scalar_lea.sflag [#allocation3], %s253_s24  ;;  %s1042_s1 = scalar_lea.hbm %s1468_s3, 64 }
  0x6b   : > { %p1043_p9 = scmp.ne.s32.totalorder %s1468_s3, %s1042_s1  ;;  %p1044_p11 = pneg %p1474_p7 }
  0x6c   : > { %s1047_s15 = scalar_lea.hbm %s1661_s0, 128  ;;  %p1048_p6 = scmp.lt.u32.totalorder %s1468_s3, %s1661_s0 }
  0x6d   : > { %p1045_p13 = pnand %p1044_p11, %p1043_p9  ;;  %p1049_p1 = scmp.lt.u32.totalorder %s1047_s15, %s1042_s1 }
  0x6e   : > { %p1051_p0 = scmp.lt.u32.totalorder %s1042_s1, %s1468_s3 }
  0x6f   : > { %p1046_p5 = pneg %p1045_p13  ;;  %p1050_p2 = por %p1049_p1, %p1048_p6 }
  0x71   : > { %p1052_p8 = por %p1051_p0, %p1050_p2 }
  0x73   : > { %p1053_p10 = pnand %p1052_p8, %p1046_p5 }
  0x75   : > { %1056 = shalt.err (!%p1053_p10)
}
  0x76   : > { %s1057_s24 = scalar_lea.vmem %s1478_s29, 64  ;;  %s1236_s20 = smov [#allocation2]  }
  0x77   : > { %p1058_p12 = scmp.ne.s32.totalorder %s1478_s29, %s1057_s24  ;;  %s1062_s11 = sshll.u32 %s1236_s20, 4  ;;  %s1063_s11 = int_to_ptr.vmem [resolvable:$false] %s1062_s11 }
  0x78   : > { %s1064_s28 = scalar_lea.vmem %s1063_s11, 128  ;;  %p1065_p13 = scmp.lt.s32.totalorder %s1478_s29, %s1063_s11 }
  0x79   : > { %p1060_p3 = pnand %p1058_p12, %p1044_p11  ;;  %p1066_p6 = scmp.lt.s32.totalorder %s1064_s28, %s1057_s24 }
  0x7b   : > { %p1061_p9 = pneg %p1060_p3  ;;  %p1067_p1 = por %p1066_p6, %p1065_p13 }
  0x7d   : > { %p1068_p2 = pnand %p1067_p1, %p1061_p9 }
  0x7f   : > { %1071 = shalt.err (!%p1068_p2)
}
  0x80   : > { %862 = dma.hbm_to_vmem [thread:$0]  (!%p1474_p7), %s1468_s3, 64, %s1478_s29, %s254_s6  }
  0x81   : > { %p1711_p5 = scmp.ne.s32.totalorder %s1702_s16, 0 }
  0x82   : > { %s1508_s1 = sand.u32 (!%p1711_p5), 1, %s1206_s25   ;;  %p1712_p11 = scmp.ne.s32.totalorder (!%p1711_p5), %s1695_s12, 0 }
  0x83   : > { %273 = sbr.rel (%p1711_p5) target bundleno = 663 (0x297), region = 40  ;;  %s744_s14 = sshll.u32 (!%p1711_p5), %s1508_s1, 2 }
  0x84   : > { %s276_s21 = scalar_lea.sflag (!%p1711_p5), [#allocation3], %s1508_s1  ;;  %s1512_s15 = scalar_lea.vmem (!%p1711_p5), [#allocation2], %s744_s14 }
  0x8a   : > { %1173 = dma.done.wait (%p1712_p11), %s276_s21, 64  }
  0x8b   : > { %1175 = vsyncadd (%p1712_p11), %s276_s21, 4294967232  ;;  %p1713_p7 = scmp.ne.s32.totalorder %s1693_s10, 0 }
  0x8d   : > { %1177 = dma.done.wait (%p1713_p7), [#allocation6], 4096  }
  0x8e   : > { %1179 = vsyncadd (%p1713_p7), [#allocation6], 4294963200  ;;  %s747_s3 = sshll.u32 %s1508_s1, 3  ;;  %v1237_v0 = vmov 0.0   ;;  %s778_s29 = sshll.u32 %s1214_s27, 6  ;;  %vm1238_vm0 = vmmov 0  }
  0x8f   : > { %798 = vmatprep.subr.bf16.mxu0 %v1237_v0  ;;  %814 = vmatprep.mubr.msk.bf16.mxu0 %vm1238_vm0, %v1237_v0  ;;  %s1524_s16 = scalar_lea.vmem [#allocation5], %s778_s29  ;;  %s1529_s10 = scalar_lea.vmem [#allocation7], %s778_s29  ;;  %v361_v15 = vld [vmem:[%s1512_s15] sm:$0xf] }
  0x90   : > { %818 = vmatprep.subr.bf16.mxu1 %v1237_v0  ;;  %834 = vmatprep.mubr.msk.bf16.mxu1 %vm1238_vm0, %v1237_v0  ;;  %v970_v1 = vld [vmem:[%s1524_s16] sm:$0xff]   ;;  %v971_v2 = vld [vmem:[%s1524_s16 + $0x8] sm:$0xff]   ;;  %v972_v3 = vld [vmem:[%s1524_s16 + $0x10] sm:$0xff]   ;;  %s341_s6 = scalar_lea.vmem %s1663_s2, %s1214_s27  ;;  %s318_s9 = sand.u32 1, %s1194_s22  }
  0x91   : > { %799 = vmatpush3.bf16.msra.mxu0 %v970_v1  ;;  %v978_v4 = vld [vmem:[%s1529_s10] sm:$0xff]   ;;  %v973_v5 = vld [vmem:[%s1524_s16 + $0x18] sm:$0xff]   ;;  %v979_v6 = vld [vmem:[%s1529_s10 + $0x8] sm:$0xff]   ;;  %s1552_s17 = sshll.u32 %s318_s9, 3  ;;  %s313_s20 = scalar_lea.vmem [#allocation8], %s747_s3 }
  0x92   : > { %800 = vmatprep.subr.bf16.mxu0 %v1237_v0  ;;  %819 = vmatpush3.bf16.msra.mxu1 %v978_v4  ;;  %v974_v7 = vld [vmem:[%s1524_s16 + $0x20] sm:$0xff]   ;;  %v980_v8 = vld [vmem:[%s1529_s10 + $0x10] sm:$0xff]   ;;  %v975_v9 = vld [vmem:[%s1524_s16 + $0x28] sm:$0xff]   ;;  %s320_s24 = scalar_lea.vmem [#allocation9], %s1552_s17  ;;  %p769_p0 = scmp.ne.s32.totalorder %s1214_s27, 0 }
  0x93   : > { %820 = vmatprep.subr.bf16.mxu1 %v1237_v0  ;;  %v981_v10 = vld [vmem:[%s1529_s10 + $0x18] sm:$0xff]   ;;  %v976_v11 = vld [vmem:[%s1524_s16 + $0x30] sm:$0xff]   ;;  %v982_v12 = vld [vmem:[%s1529_s10 + $0x20] sm:$0xff]  }
  0x94   : > { %v977_v13 = vld [vmem:[%s1524_s16 + $0x38] sm:$0xff]   ;;  %v983_v14 = vld [vmem:[%s1529_s10 + $0x28] sm:$0xff]   ;;  %v984_v16 = vld [vmem:[%s1529_s10 + $0x30] sm:$0xff]  }
  0x95   : > { %801 = vmatpush3.bf16.msra.mxu0 %v971_v2  ;;  %v985_v17 = vld [vmem:[%s1529_s10 + $0x38] sm:$0xff]   ;;  %v752_v18 = vld [vmem:[%s341_s6] ss:$0 sm:$0xff] }
  0x96   : > { %802 = vmatprep.subr.bf16.mxu0 %v1237_v0  ;;  %821 = vmatpush3.bf16.msra.mxu1 %v979_v6  ;;  %v770_v30 = vld [vmem:[%s1665_s4] ss:$0 sm:$0xff] (!%p769_p0) }
  0x97   : > { %822 = vmatprep.subr.bf16.mxu1 %v1237_v0  ;;  %558 = vst [vmem:[%s313_s20] sm:$0xff] (!%p769_p0), %v770_v30 }
  0x99   : > { %803 = vmatpush3.bf16.msra.mxu0 %v972_v3 }
  0x9a   : > { %804 = vmatprep.subr.bf16.mxu0 %v1237_v0  ;;  %823 = vmatpush3.bf16.msra.mxu1 %v980_v8 }
  0x9b   : > { %824 = vmatprep.subr.bf16.mxu1 %v1237_v0 }
  0x9d   : > { %805 = vmatpush3.bf16.msra.mxu0 %v973_v5 }
  0x9e   : > { %806 = vmatprep.subr.bf16.mxu0 %v1237_v0  ;;  %825 = vmatpush3.bf16.msra.mxu1 %v981_v10 }
  0x9f   : > { %826 = vmatprep.subr.bf16.mxu1 %v1237_v0 }
  0xa1   : > { %807 = vmatpush3.bf16.msra.mxu0 %v974_v7 }
  0xa2   : > { %808 = vmatprep.subr.bf16.mxu0 %v1237_v0  ;;  %827 = vmatpush3.bf16.msra.mxu1 %v982_v12 }
  0xa3   : > { %828 = vmatprep.subr.bf16.mxu1 %v1237_v0 }
  0xa5   : > { %809 = vmatpush3.bf16.msra.mxu0 %v975_v9 }
  0xa6   : > { %810 = vmatprep.subr.bf16.mxu0 %v1237_v0  ;;  %829 = vmatpush3.bf16.msra.mxu1 %v983_v14 }
  0xa7   : > { %830 = vmatprep.subr.bf16.mxu1 %v1237_v0 }
  0xa9   : > { %811 = vmatpush3.bf16.msra.mxu0 %v976_v11 }
  0xaa   : > { %812 = vmatprep.subr.bf16.mxu0 %v1237_v0  ;;  %831 = vmatpush3.bf16.msra.mxu1 %v984_v16 }
  0xab   : > { %832 = vmatprep.subr.bf16.mxu1 %v1237_v0 }
  0xad   : > { %813 = vmatpush3.bf16.msra.mxu0 %v977_v13 }
  0xae   : > { %833 = vmatpush3.bf16.msra.mxu1 %v985_v17 }
  0xb0   : > { %815 = vmatmul.mubr.bf16.vlgmr.msra.gmra.mrb[0].mxu0 %v361_v15 }
 0x183   : > { %v450_v19 = vpop.f32.mrb[0].mxu0 }
 0x184   : > { %v451_v20 = vadd.f32 %v752_v18, %v450_v19  ;;  %v816_v21 = vpop.f32.mrb[1].mxu0 }
 0x185   : > { %v453_v22 = vpop.f32.mrb[2].mxu0 }
 0x186   : > { %v456_v23 = vmax.f32 %v451_v20, 0.0  ;;  %v817_v24 = vpop.f32.mrb[3].mxu0 }
 0x188   : > { %457 = vst [vmem:[%s320_s24] sm:$0xff] %v456_v23  ;;  %v458_v25 = vpack.c.bf16 %v456_v23, %v456_v23 }
 0x18a   : > { %835 = vmatmul.mubr.bf16.vlgmr.msra.gmra.mrb[0].mxu1 %v458_v25 }
 0x25a   : > { %550 = sbr.rel (%p769_p0) target bundleno = 609 (0x261), region = 56 }
 0x25d   : > { %v541_v26 = vpop.f32.mrb[0].mxu1 }
 0x25e   : > { %v836_v27 = vpop.f32.mrb[1].mxu1 }
 0x25f   : > { %v544_v28 = vpop.f32.mrb[2].mxu1 }
 0x260   : > { %v837_v29 = vpop.f32.mrb[3].mxu1 }
 0x261 PF: > { %v559_v31 = vld [vmem:[%s313_s20] sm:$0xff]  ;;  %s1714_s14 = sld [smem:[#allocation17_spill]]  ;;  %s1715_s16 = sld [smem:[#allocation25_spill]] }
 0x262   : > { %v560_v32 = vadd.f32 %v559_v31, %v541_v26  ;;  %s581_s10 = sshll.u32 %s313_s20, 4  ;;  %s1570_s13 = sshll.u32 %s320_s24, 4  ;;  %s1567_s10 = int_to_ptr.vmem [resolvable:$true] %s581_s10  ;;  %s1598_s13 = int_to_ptr.vmem [resolvable:$true] %s1570_s13 }
 0x263   : > { %s563_s6 = scalar_lea.sflag [#allocation4], %s1508_s1  ;;  %s1072_s17 = scalar_lea.vmem %s1567_s10, 128 }
 0x264   : > { %561 = vst [vmem:[%s313_s20] sm:$0xff] %v560_v32  ;;  %p1073_p8 = scmp.ne.s32.totalorder %s1567_s10, %s1072_s17  ;;  %s1239_s11 = smov [#allocation8]  }
 0x265   : > { %s1076_s28 = sshll.u32 %s1239_s11, 4  ;;  %s1077_s28 = int_to_ptr.vmem [resolvable:$false] %s1076_s28 }
 0x266   : > { %p1074_p10 = pnand %p1073_p8, %p1445_p4  ;;  %p1079_p3 = scmp.lt.s32.totalorder %s1567_s10, %s1077_s28 }
 0x267   : > { %s773_s21 = sshll.u32 %s1714_s14, 7  ;;  %s774_s12 = sshll.u32 %s1714_s14, 1 }
 0x268   : > { %s1565_s3 = scalar_lea.hbm %s1715_s16, %s773_s21  ;;  %p1075_p12 = pneg %p1074_p10 }
 0x269   : > { %s1078_s21 = scalar_lea.vmem %s1077_s28, 256 }
 0x26a   : > { %p1080_p9 = scmp.lt.s32.totalorder %s1078_s21, %s1072_s17 }
 0x26c   : > { %p1081_p13 = por %p1080_p9, %p1079_p3 }
 0x26e   : > { %p1082_p6 = pnand %p1081_p13, %p1075_p12 }
 0x270   : > { %1085 = shalt.err (!%p1082_p6)
}
 0x271   : > { %s1086_s1 = scalar_lea.hbm %s1565_s3, 128  ;;  %s1090_s15 = scalar_lea.hbm %s1715_s16, 256 }
 0x272   : > { %p1087_p1 = scmp.ne.s32.totalorder %s1565_s3, %s1086_s1  ;;  %p1091_p11 = scmp.lt.u32.totalorder %s1565_s3, %s1715_s16 }
 0x273   : > { %p1092_p7 = scmp.lt.u32.totalorder %s1090_s15, %s1086_s1  ;;  %p1094_p8 = scmp.lt.u32.totalorder %s1086_s1, %s1565_s3 }
 0x274   : > { %p1088_p2 = pnand %p1087_p1, %p1445_p4 }
 0x275   : > { %p1093_p0 = por %p1092_p7, %p1091_p11 }
 0x276   : > { %p1089_p5 = pneg %p1088_p2 }
 0x277   : > { %p1095_p10 = por %p1094_p8, %p1093_p0 }
 0x279   : > { %p1096_p12 = pnand %p1095_p10, %p1089_p5 }
 0x27b   : > { %1099 = shalt.err (!%p1096_p12)
}
 0x27c   : > { %s1716_s17 = sld [smem:[#allocation20_spill]]  ;;  %s592_s28 = sadd.s32 %s1214_s27, %s774_s12 }
 0x27d   : > { %848 = dma.vmem_to_hbm [thread:$0]  (%p1445_p4), %s1567_s10, 128, %s1565_s3, %s563_s6  }
 0x27e   : > { %s775_s21 = sshll.u32 %s592_s28, 7  ;;  %s1717_s20 = sld [smem:[#allocation26_spill]] }
 0x27f   : > { %s568_s15 = scalar_lea.sflag [#allocation10], %s318_s9  ;;  %s1100_s29 = scalar_lea.vmem %s1598_s13, 128 }
 0x280   : > { %p1101_p3 = scmp.ne.s32.totalorder %s1598_s13, %s1100_s29  ;;  %s1240_s3 = smov [#allocation9]  }
 0x281   : > { %s1104_s14 = sshll.u32 %s1240_s3, 4  ;;  %s1105_s14 = int_to_ptr.vmem [resolvable:$false] %s1104_s14 }
 0x282   : > { %p1718_p9 = scmp.ne.s32.totalorder %s1716_s17, 0  ;;  %s1106_s27 = scalar_lea.vmem %s1105_s14, 256 }
 0x283   : > { %p1107_p4 = scmp.lt.s32.totalorder %s1598_s13, %s1105_s14  ;;  %p1108_p1 = scmp.lt.s32.totalorder %s1106_s27, %s1100_s29 }
 0x284   : > { %s594_s8 = scalar_lea.hbm %s1717_s20, %s775_s21  ;;  %p1102_p13 = pnand %p1101_p3, %p1718_p9 }
 0x285   : > { %p1109_p2 = por %p1108_p1, %p1107_p4 }
 0x286   : > { %p1103_p6 = pneg %p1102_p13 }
 0x288   : > { %p1110_p5 = pnand %p1109_p2, %p1103_p6 }
 0x28a   : > { %1113 = shalt.err (!%p1110_p5)
}
 0x28b   : > { %s1114_s10 = scalar_lea.hbm %s594_s8, 128  ;;  %s1118_s6 = scalar_lea.hbm %s1717_s20, 512 }
 0x28c   : > { %p1115_p11 = scmp.ne.s32.totalorder %s594_s8, %s1114_s10  ;;  %p1119_p8 = scmp.lt.u32.totalorder %s594_s8, %s1717_s20 }
 0x28d   : > { %p1120_p10 = scmp.lt.u32.totalorder %s1118_s6, %s1114_s10  ;;  %p1122_p3 = scmp.lt.u32.totalorder %s1114_s10, %s594_s8 }
 0x28e   : > { %p1116_p7 = pnand %p1115_p11, %p1718_p9 }
 0x28f   : > { %p1121_p12 = por %p1120_p10, %p1119_p8 }
 0x290   : > { %p1117_p0 = pneg %p1116_p7 }
 0x291   : > { %p1123_p13 = por %p1122_p3, %p1121_p12 }
 0x293   : > { %p1124_p6 = pnand %p1123_p13, %p1117_p0 }
 0x295   : > { %1127 = shalt.err (!%p1124_p6)
}
 0x296   : > { %849 = dma.vmem_to_hbm [thread:$0]  (%p1718_p9), %s1598_s13, 128, %s594_s8, %s568_s15  }
 0x297 PF: > { %s1719_s21 = sld [smem:[#allocation16_spill]]  ;;  %s1720_s1 = sld [smem:[#allocation19_spill]] }
 0x298   : > { %p875_p4 = scmp.ge.s32.totalorder %s1230_s7, 2 }
 0x29d   : > { %s608_s24 = sand.u32 1, %s1719_s21   ;;  %p1721_p1 = scmp.ne.s32.totalorder %s1720_s1, 0 }
 0x29e   : > { %s609_s29 = scalar_lea.sflag [#allocation4], %s608_s24 }
 0x29f   : > { %p864_p2 = pnand %p875_p4, %p1721_p1 }
 0x2a1   : > { %1181 = dma.done.wait (!%p864_p2), %s609_s29, 128  }
 0x2a2   : > { %1183 = vsyncadd (!%p864_p2), %s609_s29, 4294967168  ;;  %s1722_s3 = sld [smem:[#allocation15_spill]]  ;;  %s1723_s14 = sld [smem:[#allocation21_spill]] }
 0x2a8   : > { %s617_s27 = sand.u32 1, %s1722_s3   ;;  %p1724_p5 = scmp.ne.s32.totalorder %s1723_s14, 0 }
 0x2a9   : > { %s618_s10 = scalar_lea.sflag [#allocation10], %s617_s27 }
 0x2aa   : > { %p867_p11 = pnand %p875_p4, %p1724_p5 }
 0x2ac   : > { %1185 = dma.done.wait (!%p867_p11), %s618_s10, 128  }
 0x2ad   : > { %1187 = vsyncadd (!%p867_p11), %s618_s10, 4294967168  ;;  %s27_s7 = sadd.s32 1, %s1230_s7   ;;  %s1725_s27 = sld [smem:[#allocation18_spill]] }
 0x2ae   : > { %p24_p9 = scmp.ge.s32.totalorder %s27_s7, 6   ;;  %s1726_s29 = sld [smem:[#allocation22_spill]] }
 0x2af   : > { %s1727_s21 = smov %s1194_s22  ;;  %s1728_s22 = smov %s1198_s23 }
 0x2b0   : > { %s1729_s23 = smov %s1463_s5  ;;  %s1730_s24 = smov %s1206_s25 }
 0x2b1   : > { %s1731_s25 = smov %s1210_s26  ;;  %s1732_s26 = smov %s1460_s18 }
 0x2b2   : > { %s1733_s28 = smov %s1226_s30  ;;  %s1734_s30 = smov %s1740_s19 }
 0x2b3   :  { %26 = sbr.rel (!%p24_p9) target bundleno = 17 (0x11), region = 117 }
 0x2ba   :  { %623 = vsyncpa [#allocation3], 1 }
 0x2bb   :  { %625 = vsyncpa [#allocation3 + $0x1], 1 }
 0x2bc   :  { %626 = vsyncpa [#allocation6], 1 }
 0x2bd   :  { %627 = vsyncpa [#allocation4], 1 }
 0x2be   :  { %629 = vsyncpa [#allocation4 + $0x1], 1 }
 0x2bf   :  { %630 = vsyncpa [#allocation10], 1 }
 0x2c0   :  { %632 = vsyncpa [#allocation10 + $0x1], 1 }

</bundles_post_ra>
